<compile_context>
chip_gen: v7x
topology: tpu7x:2x2x1
jax: 0.10.0
libtpu: 0.0.40
codegen_flags: <defaults>
</compile_context>

<pallas_src>
import jax
import jax.numpy as jnp
from jax.experimental import pallas as pl
from jax.experimental.pallas import tpu as pltpu


# ----------------------------- Pallas kernels ------------------------------ #

def _conv3x3_stats_kernel(params_ref, x_ref, out_ref, stats_ref):
    """Direct 3x3, Cout=1 conv as a VPU weighted sum + per-batch stat partials.

    params_ref : SMEM (C*9 + 1,) f32  -- flattened conv weights, then bias
    x_ref      : VMEM (1, C, H+2, W+2) f32  -- spatially padded input block
    out_ref    : VMEM (1, H, W) f32         -- conv output block (dense stores)
    stats_ref  : SMEM (N, 4) f32            -- [min, max, sum, sumsq] per batch
    """
    n = pl.program_id(0)
    C = x_ref.shape[1]
    H = out_ref.shape[1]
    W = out_ref.shape[2]

    xp = x_ref[0]                                   # (C, H+2, W+2) in vregs
    acc = jnp.zeros((H, W), dtype=jnp.float32)
    # 9*C shifted scalar*vector multiply-adds (VPU); weights read from SMEM.
    for c in range(C):
        for ky in range(3):
            for kx in range(3):
                w = params_ref[c * 9 + ky * 3 + kx]
                acc = acc + w * xp[c, ky:ky + H, kx:kx + W]
    acc = acc + params_ref[C * 9]                   # bias

    out_ref[0] = acc

    # Per-batch partial statistics, emitted in the same pass (no extra HBM read).
    stats_ref[n, 0] = jnp.min(acc)
    stats_ref[n, 1] = jnp.max(acc)
    stats_ref[n, 2] = jnp.sum(acc)
    stats_ref[n, 3] = jnp.sum(acc * acc)


def _affine_kernel(ab_ref, x_ref, o_ref):
    """Single fused normalize pass: out = x * scale + offset.

    min/max/mean/std are pre-folded host-side into (scale, offset), so the
    per-element work is one mul + one add (no in-kernel divisions -> no EUP
    pressure, no repeated subtractions).
    """
    o_ref[...] = x_ref[...] * ab_ref[0] + ab_ref[1]


# ------------------------------ wrappers ----------------------------------- #

_SMEM_SPEC = pl.BlockSpec(memory_space=pltpu.MemorySpace.SMEM)


def predictor_detector_wrapper_forward(x, conv_w, conv_b):
    """Mirrors PredictorDetectorWrapper.forward for a 4-D tensor input.

    x      : (N, C, H, W) float32
    conv_w : (1, C, 3, 3) float32   synthetic predictor Conv2d(C, 1, 3, pad=1)
    conv_b : (1,)         float32
    """
    N, C, H, W = x.shape

    # Spatial zero-padding for the 3x3 / pad=1 conv (cheap, done once).
    xp = jnp.pad(x.astype(jnp.float32), ((0, 0), (0, 0), (1, 1), (1, 1)))
    params = jnp.concatenate(
        [conv_w.reshape(-1), conv_b.reshape(-1)]).astype(jnp.float32)   # (C*9+1,)

    # ---- Pass 1: conv + fused per-batch stat partials (one pallas_call) ---- #
    conv_out, partials = pl.pallas_call(
        _conv3x3_stats_kernel,
        out_shape=(jax.ShapeDtypeStruct((N, H, W), jnp.float32),
                   jax.ShapeDtypeStruct((N, 4), jnp.float32)),
        grid=(N,),
        in_specs=[
            _SMEM_SPEC,                                           # weights+bias
            pl.BlockSpec((1, C, H + 2, W + 2), lambda n: (n, 0, 0, 0)),
        ],
        out_specs=(
            pl.BlockSpec((1, H, W), lambda n: (n, 0, 0)),
            _SMEM_SPEC,                                           # stat partials
        ),
        # "arbitrary": the stats output is a whole-array SMEM ref written by
        # every grid step, so it must not be sharded across TensorCores.
        compiler_params=pltpu.CompilerParams(
            dimension_semantics=("arbitrary",)),
    )(params, xp)

    # ---- Tiny host epilogue: combine partials, fold into scale/offset ------ #
    mn = jnp.min(partials[:, 0])
    mx = jnp.max(partials[:, 1])
    s = jnp.sum(partials[:, 2])
    sq = jnp.sum(partials[:, 3])
    n_elems = jnp.float32(N * H * W)

    mean_x = s / n_elems
    var_x = (sq - s * s / n_elems) / (n_elems - 1.0)      # unbiased (torch .std())
    var_x = jnp.maximum(var_x, 0.0)                       # guard fp rounding
    std_x = jnp.sqrt(var_x)

    # z = (x - mn) / (mx - mn);  out = (z - mean_z) / std_z   ==>  out = x*a + b
    r = mx - mn                                           # NaN/inf if mx==mn, as in torch
    mean_z = (mean_x - mn) / r
    std_z = std_x / r
    scale = 1.0 / (r * std_z)
    offset = -mn * scale - mean_z / std_z
    ab = jnp.stack([scale, offset]).astype(jnp.float32)   # (2,) -> SMEM

    # ---- Pass 2: single elementwise affine normalize (one pallas_call) ----- #
    normed = pl.pallas_call(
        _affine_kernel,
        out_shape=jax.ShapeDtypeStruct((N, H, W), jnp.float32),
        grid=(N,),
        in_specs=[
            _SMEM_SPEC,                                           # [scale, offset]
            pl.BlockSpec((1, H, W), lambda n: (n, 0, 0)),
        ],
        out_specs=pl.BlockSpec((1, H, W), lambda n: (n, 0, 0)),
        compiler_params=pltpu.CompilerParams(
            dimension_semantics=("parallel",)),                   # megacore on v7x
    )(ab, conv_out)

    detection_target = normed.reshape(N, 1, H, W)
    # detector.detect(detection_target[0], plain_result=True) is opaque; return
    # the normalized slice it would consume.
    result = detection_target[0]
    return [result]


# -------------------------- pure-JAX reference ------------------------------ #

def _reference_forward(x, conv_w, conv_b):
    N, C, H, W = x.shape
    xp = jnp.pad(x.astype(jnp.float32), ((0, 0), (0, 0), (1, 1), (1, 1)))
    out = jnp.zeros((N, H, W), jnp.float32) + conv_b[0]
    for c in range(C):
        for ky in range(3):
            for kx in range(3):
                out = out + conv_w[0, c, ky, kx] * xp[:, c, ky:ky + H, kx:kx + W]
    dt = out.reshape(N, 1, H, W)
    dt = (dt - dt.min()) / (dt.max() - dt.min())
    dt = (dt - dt.mean()) / jnp.std(dt, ddof=1)
    return dt[0]


# --------------------------------- main ------------------------------------ #

if __name__ == "__main__":
    key = jax.random.PRNGKey(0)
    k_x, k_w, k_b = jax.random.split(key, 3)

    N, C, H, W = 2, 4, 16, 16
    x = jax.random.normal(k_x, (N, C, H, W), dtype=jnp.float32)

    # Deterministic synthetic predictor parameters: Conv2d(C, 1, 3, padding=1).
    conv_w = 0.1 * jax.random.normal(k_w, (1, C, 3, 3), dtype=jnp.float32)
    conv_b = 0.01 * jax.random.normal(k_b, (1,), dtype=jnp.float32)

    out = predictor_detector_wrapper_forward(x, conv_w, conv_b)
    jax.block_until_ready(out[0])
    assert out[0].shape == (1, H, W)

    ref = _reference_forward(x, conv_w, conv_b)
    assert jnp.allclose(out[0], ref, rtol=1e-4, atol=1e-4), "mismatch vs reference"

    print("KERNEL_OK")
</pallas_src>

<mosaic_0001>
module attributes {stable_mosaic.version = 11 : i64} {
  func.func @_conv3x3_stats_kernel(%arg0: i32, %arg1: memref<37xf32, #tpu.memory_space<smem>>, %arg2: memref<1x4x18x18xf32, #tpu.memory_space<vmem>>, %arg3: memref<1x16x16xf32, #tpu.memory_space<vmem>>, %arg4: memref<2x4xf32, #tpu.memory_space<smem>>) attributes {dimension_semantics = [#tpu.dimension_semantics<arbitrary>], iteration_bounds = array<i64: 2>, scalar_prefetch = 0 : i64, scratch_operands = 0 : i64, tpu.core_type = #tpu.core_type<tc>, window_params = [{transform_indices = @transform_0, window_bounds = array<i64: 37>}, {transform_indices = @transform_1, window_bounds = array<i64: 1, 4, 18, 18>}, {transform_indices = @transform_2, window_bounds = array<i64: 1, 16, 16>}, {transform_indices = @transform_3, window_bounds = array<i64: 2, 4>}]} {
    %c0 = arith.constant 0 : index
    %c0_0 = arith.constant 0 : index
    %c0_1 = arith.constant 0 : index
    %c0_2 = arith.constant 0 : index
    %0 = vector.load %arg2[%c0, %c0_0, %c0_1, %c0_2] : memref<1x4x18x18xf32, #tpu.memory_space<vmem>>, vector<1x4x18x18xf32>
    %1 = vector.shape_cast %0 : vector<1x4x18x18xf32> to vector<4x18x18xf32>
    %cst = arith.constant 0.000000e+00 : f32
    %2 = vector.broadcast %cst : f32 to vector<16x16xf32>
    %c0_3 = arith.constant 0 : index
    %3 = memref.load %arg1[%c0_3] : memref<37xf32, #tpu.memory_space<smem>>
    %4 = vector.extract_strided_slice %1 {offsets = [0, 0, 0], sizes = [1, 16, 16], strides = [1, 1, 1]} : vector<4x18x18xf32> to vector<1x16x16xf32>
    %5 = vector.shape_cast %4 : vector<1x16x16xf32> to vector<16x16xf32>
    %6 = vector.broadcast %3 : f32 to vector<16x16xf32>
    %7 = arith.mulf %6, %5 : vector<16x16xf32>
    %8 = arith.addf %2, %7 : vector<16x16xf32>
    %c1 = arith.constant 1 : index
    %9 = memref.load %arg1[%c1] : memref<37xf32, #tpu.memory_space<smem>>
    %10 = vector.extract_strided_slice %1 {offsets = [0, 0, 1], sizes = [1, 16, 16], strides = [1, 1, 1]} : vector<4x18x18xf32> to vector<1x16x16xf32>
    %11 = vector.shape_cast %10 : vector<1x16x16xf32> to vector<16x16xf32>
    %12 = vector.broadcast %9 : f32 to vector<16x16xf32>
    %13 = arith.mulf %12, %11 : vector<16x16xf32>
    %14 = arith.addf %8, %13 : vector<16x16xf32>
    %c2 = arith.constant 2 : index
    %15 = memref.load %arg1[%c2] : memref<37xf32, #tpu.memory_space<smem>>
    %16 = vector.extract_strided_slice %1 {offsets = [0, 0, 2], sizes = [1, 16, 16], strides = [1, 1, 1]} : vector<4x18x18xf32> to vector<1x16x16xf32>
    %17 = vector.shape_cast %16 : vector<1x16x16xf32> to vector<16x16xf32>
    %18 = vector.broadcast %15 : f32 to vector<16x16xf32>
    %19 = arith.mulf %18, %17 : vector<16x16xf32>
    %20 = arith.addf %14, %19 : vector<16x16xf32>
    %c3 = arith.constant 3 : index
    %21 = memref.load %arg1[%c3] : memref<37xf32, #tpu.memory_space<smem>>
    %22 = vector.extract_strided_slice %1 {offsets = [0, 1, 0], sizes = [1, 16, 16], strides = [1, 1, 1]} : vector<4x18x18xf32> to vector<1x16x16xf32>
    %23 = vector.shape_cast %22 : vector<1x16x16xf32> to vector<16x16xf32>
    %24 = vector.broadcast %21 : f32 to vector<16x16xf32>
    %25 = arith.mulf %24, %23 : vector<16x16xf32>
    %26 = arith.addf %20, %25 : vector<16x16xf32>
    %c4 = arith.constant 4 : index
    %27 = memref.load %arg1[%c4] : memref<37xf32, #tpu.memory_space<smem>>
    %28 = vector.extract_strided_slice %1 {offsets = [0, 1, 1], sizes = [1, 16, 16], strides = [1, 1, 1]} : vector<4x18x18xf32> to vector<1x16x16xf32>
    %29 = vector.shape_cast %28 : vector<1x16x16xf32> to vector<16x16xf32>
    %30 = vector.broadcast %27 : f32 to vector<16x16xf32>
    %31 = arith.mulf %30, %29 : vector<16x16xf32>
    %32 = arith.addf %26, %31 : vector<16x16xf32>
    %c5 = arith.constant 5 : index
    %33 = memref.load %arg1[%c5] : memref<37xf32, #tpu.memory_space<smem>>
    %34 = vector.extract_strided_slice %1 {offsets = [0, 1, 2], sizes = [1, 16, 16], strides = [1, 1, 1]} : vector<4x18x18xf32> to vector<1x16x16xf32>
    %35 = vector.shape_cast %34 : vector<1x16x16xf32> to vector<16x16xf32>
    %36 = vector.broadcast %33 : f32 to vector<16x16xf32>
    %37 = arith.mulf %36, %35 : vector<16x16xf32>
    %38 = arith.addf %32, %37 : vector<16x16xf32>
    %c6 = arith.constant 6 : index
    %39 = memref.load %arg1[%c6] : memref<37xf32, #tpu.memory_space<smem>>
    %40 = vector.extract_strided_slice %1 {offsets = [0, 2, 0], sizes = [1, 16, 16], strides = [1, 1, 1]} : vector<4x18x18xf32> to vector<1x16x16xf32>
    %41 = vector.shape_cast %40 : vector<1x16x16xf32> to vector<16x16xf32>
    %42 = vector.broadcast %39 : f32 to vector<16x16xf32>
    %43 = arith.mulf %42, %41 : vector<16x16xf32>
    %44 = arith.addf %38, %43 : vector<16x16xf32>
    %c7 = arith.constant 7 : index
    %45 = memref.load %arg1[%c7] : memref<37xf32, #tpu.memory_space<smem>>
    %46 = vector.extract_strided_slice %1 {offsets = [0, 2, 1], sizes = [1, 16, 16], strides = [1, 1, 1]} : vector<4x18x18xf32> to vector<1x16x16xf32>
    %47 = vector.shape_cast %46 : vector<1x16x16xf32> to vector<16x16xf32>
    %48 = vector.broadcast %45 : f32 to vector<16x16xf32>
    %49 = arith.mulf %48, %47 : vector<16x16xf32>
    %50 = arith.addf %44, %49 : vector<16x16xf32>
    %c8 = arith.constant 8 : index
    %51 = memref.load %arg1[%c8] : memref<37xf32, #tpu.memory_space<smem>>
    %52 = vector.extract_strided_slice %1 {offsets = [0, 2, 2], sizes = [1, 16, 16], strides = [1, 1, 1]} : vector<4x18x18xf32> to vector<1x16x16xf32>
    %53 = vector.shape_cast %52 : vector<1x16x16xf32> to vector<16x16xf32>
    %54 = vector.broadcast %51 : f32 to vector<16x16xf32>
    %55 = arith.mulf %54, %53 : vector<16x16xf32>
    %56 = arith.addf %50, %55 : vector<16x16xf32>
    %c9 = arith.constant 9 : index
    %57 = memref.load %arg1[%c9] : memref<37xf32, #tpu.memory_space<smem>>
    %58 = vector.extract_strided_slice %1 {offsets = [1, 0, 0], sizes = [1, 16, 16], strides = [1, 1, 1]} : vector<4x18x18xf32> to vector<1x16x16xf32>
    %59 = vector.shape_cast %58 : vector<1x16x16xf32> to vector<16x16xf32>
    %60 = vector.broadcast %57 : f32 to vector<16x16xf32>
    %61 = arith.mulf %60, %59 : vector<16x16xf32>
    %62 = arith.addf %56, %61 : vector<16x16xf32>
    %c10 = arith.constant 10 : index
    %63 = memref.load %arg1[%c10] : memref<37xf32, #tpu.memory_space<smem>>
    %64 = vector.extract_strided_slice %1 {offsets = [1, 0, 1], sizes = [1, 16, 16], strides = [1, 1, 1]} : vector<4x18x18xf32> to vector<1x16x16xf32>
    %65 = vector.shape_cast %64 : vector<1x16x16xf32> to vector<16x16xf32>
    %66 = vector.broadcast %63 : f32 to vector<16x16xf32>
    %67 = arith.mulf %66, %65 : vector<16x16xf32>
    %68 = arith.addf %62, %67 : vector<16x16xf32>
    %c11 = arith.constant 11 : index
    %69 = memref.load %arg1[%c11] : memref<37xf32, #tpu.memory_space<smem>>
    %70 = vector.extract_strided_slice %1 {offsets = [1, 0, 2], sizes = [1, 16, 16], strides = [1, 1, 1]} : vector<4x18x18xf32> to vector<1x16x16xf32>
    %71 = vector.shape_cast %70 : vector<1x16x16xf32> to vector<16x16xf32>
    %72 = vector.broadcast %69 : f32 to vector<16x16xf32>
    %73 = arith.mulf %72, %71 : vector<16x16xf32>
    %74 = arith.addf %68, %73 : vector<16x16xf32>
    %c12 = arith.constant 12 : index
    %75 = memref.load %arg1[%c12] : memref<37xf32, #tpu.memory_space<smem>>
    %76 = vector.extract_strided_slice %1 {offsets = [1, 1, 0], sizes = [1, 16, 16], strides = [1, 1, 1]} : vector<4x18x18xf32> to vector<1x16x16xf32>
    %77 = vector.shape_cast %76 : vector<1x16x16xf32> to vector<16x16xf32>
    %78 = vector.broadcast %75 : f32 to vector<16x16xf32>
    %79 = arith.mulf %78, %77 : vector<16x16xf32>
    %80 = arith.addf %74, %79 : vector<16x16xf32>
    %c13 = arith.constant 13 : index
    %81 = memref.load %arg1[%c13] : memref<37xf32, #tpu.memory_space<smem>>
    %82 = vector.extract_strided_slice %1 {offsets = [1, 1, 1], sizes = [1, 16, 16], strides = [1, 1, 1]} : vector<4x18x18xf32> to vector<1x16x16xf32>
    %83 = vector.shape_cast %82 : vector<1x16x16xf32> to vector<16x16xf32>
    %84 = vector.broadcast %81 : f32 to vector<16x16xf32>
    %85 = arith.mulf %84, %83 : vector<16x16xf32>
    %86 = arith.addf %80, %85 : vector<16x16xf32>
    %c14 = arith.constant 14 : index
    %87 = memref.load %arg1[%c14] : memref<37xf32, #tpu.memory_space<smem>>
    %88 = vector.extract_strided_slice %1 {offsets = [1, 1, 2], sizes = [1, 16, 16], strides = [1, 1, 1]} : vector<4x18x18xf32> to vector<1x16x16xf32>
    %89 = vector.shape_cast %88 : vector<1x16x16xf32> to vector<16x16xf32>
    %90 = vector.broadcast %87 : f32 to vector<16x16xf32>
    %91 = arith.mulf %90, %89 : vector<16x16xf32>
    %92 = arith.addf %86, %91 : vector<16x16xf32>
    %c15 = arith.constant 15 : index
    %93 = memref.load %arg1[%c15] : memref<37xf32, #tpu.memory_space<smem>>
    %94 = vector.extract_strided_slice %1 {offsets = [1, 2, 0], sizes = [1, 16, 16], strides = [1, 1, 1]} : vector<4x18x18xf32> to vector<1x16x16xf32>
    %95 = vector.shape_cast %94 : vector<1x16x16xf32> to vector<16x16xf32>
    %96 = vector.broadcast %93 : f32 to vector<16x16xf32>
    %97 = arith.mulf %96, %95 : vector<16x16xf32>
    %98 = arith.addf %92, %97 : vector<16x16xf32>
    %c16 = arith.constant 16 : index
    %99 = memref.load %arg1[%c16] : memref<37xf32, #tpu.memory_space<smem>>
    %100 = vector.extract_strided_slice %1 {offsets = [1, 2, 1], sizes = [1, 16, 16], strides = [1, 1, 1]} : vector<4x18x18xf32> to vector<1x16x16xf32>
    %101 = vector.shape_cast %100 : vector<1x16x16xf32> to vector<16x16xf32>
    %102 = vector.broadcast %99 : f32 to vector<16x16xf32>
    %103 = arith.mulf %102, %101 : vector<16x16xf32>
    %104 = arith.addf %98, %103 : vector<16x16xf32>
    %c17 = arith.constant 17 : index
    %105 = memref.load %arg1[%c17] : memref<37xf32, #tpu.memory_space<smem>>
    %106 = vector.extract_strided_slice %1 {offsets = [1, 2, 2], sizes = [1, 16, 16], strides = [1, 1, 1]} : vector<4x18x18xf32> to vector<1x16x16xf32>
    %107 = vector.shape_cast %106 : vector<1x16x16xf32> to vector<16x16xf32>
    %108 = vector.broadcast %105 : f32 to vector<16x16xf32>
    %109 = arith.mulf %108, %107 : vector<16x16xf32>
    %110 = arith.addf %104, %109 : vector<16x16xf32>
    %c18 = arith.constant 18 : index
    %111 = memref.load %arg1[%c18] : memref<37xf32, #tpu.memory_space<smem>>
    %112 = vector.extract_strided_slice %1 {offsets = [2, 0, 0], sizes = [1, 16, 16], strides = [1, 1, 1]} : vector<4x18x18xf32> to vector<1x16x16xf32>
    %113 = vector.shape_cast %112 : vector<1x16x16xf32> to vector<16x16xf32>
    %114 = vector.broadcast %111 : f32 to vector<16x16xf32>
    %115 = arith.mulf %114, %113 : vector<16x16xf32>
    %116 = arith.addf %110, %115 : vector<16x16xf32>
    %c19 = arith.constant 19 : index
    %117 = memref.load %arg1[%c19] : memref<37xf32, #tpu.memory_space<smem>>
    %118 = vector.extract_strided_slice %1 {offsets = [2, 0, 1], sizes = [1, 16, 16], strides = [1, 1, 1]} : vector<4x18x18xf32> to vector<1x16x16xf32>
    %119 = vector.shape_cast %118 : vector<1x16x16xf32> to vector<16x16xf32>
    %120 = vector.broadcast %117 : f32 to vector<16x16xf32>
    %121 = arith.mulf %120, %119 : vector<16x16xf32>
    %122 = arith.addf %116, %121 : vector<16x16xf32>
    %c20 = arith.constant 20 : index
    %123 = memref.load %arg1[%c20] : memref<37xf32, #tpu.memory_space<smem>>
    %124 = vector.extract_strided_slice %1 {offsets = [2, 0, 2], sizes = [1, 16, 16], strides = [1, 1, 1]} : vector<4x18x18xf32> to vector<1x16x16xf32>
    %125 = vector.shape_cast %124 : vector<1x16x16xf32> to vector<16x16xf32>
    %126 = vector.broadcast %123 : f32 to vector<16x16xf32>
    %127 = arith.mulf %126, %125 : vector<16x16xf32>
    %128 = arith.addf %122, %127 : vector<16x16xf32>
    %c21 = arith.constant 21 : index
    %129 = memref.load %arg1[%c21] : memref<37xf32, #tpu.memory_space<smem>>
    %130 = vector.extract_strided_slice %1 {offsets = [2, 1, 0], sizes = [1, 16, 16], strides = [1, 1, 1]} : vector<4x18x18xf32> to vector<1x16x16xf32>
    %131 = vector.shape_cast %130 : vector<1x16x16xf32> to vector<16x16xf32>
    %132 = vector.broadcast %129 : f32 to vector<16x16xf32>
    %133 = arith.mulf %132, %131 : vector<16x16xf32>
    %134 = arith.addf %128, %133 : vector<16x16xf32>
    %c22 = arith.constant 22 : index
    %135 = memref.load %arg1[%c22] : memref<37xf32, #tpu.memory_space<smem>>
    %136 = vector.extract_strided_slice %1 {offsets = [2, 1, 1], sizes = [1, 16, 16], strides = [1, 1, 1]} : vector<4x18x18xf32> to vector<1x16x16xf32>
    %137 = vector.shape_cast %136 : vector<1x16x16xf32> to vector<16x16xf32>
    %138 = vector.broadcast %135 : f32 to vector<16x16xf32>
    %139 = arith.mulf %138, %137 : vector<16x16xf32>
    %140 = arith.addf %134, %139 : vector<16x16xf32>
    %c23 = arith.constant 23 : index
    %141 = memref.load %arg1[%c23] : memref<37xf32, #tpu.memory_space<smem>>
    %142 = vector.extract_strided_slice %1 {offsets = [2, 1, 2], sizes = [1, 16, 16], strides = [1, 1, 1]} : vector<4x18x18xf32> to vector<1x16x16xf32>
    %143 = vector.shape_cast %142 : vector<1x16x16xf32> to vector<16x16xf32>
    %144 = vector.broadcast %141 : f32 to vector<16x16xf32>
    %145 = arith.mulf %144, %143 : vector<16x16xf32>
    %146 = arith.addf %140, %145 : vector<16x16xf32>
    %c24 = arith.constant 24 : index
    %147 = memref.load %arg1[%c24] : memref<37xf32, #tpu.memory_space<smem>>
    %148 = vector.extract_strided_slice %1 {offsets = [2, 2, 0], sizes = [1, 16, 16], strides = [1, 1, 1]} : vector<4x18x18xf32> to vector<1x16x16xf32>
    %149 = vector.shape_cast %148 : vector<1x16x16xf32> to vector<16x16xf32>
    %150 = vector.broadcast %147 : f32 to vector<16x16xf32>
    %151 = arith.mulf %150, %149 : vector<16x16xf32>
    %152 = arith.addf %146, %151 : vector<16x16xf32>
    %c25 = arith.constant 25 : index
    %153 = memref.load %arg1[%c25] : memref<37xf32, #tpu.memory_space<smem>>
    %154 = vector.extract_strided_slice %1 {offsets = [2, 2, 1], sizes = [1, 16, 16], strides = [1, 1, 1]} : vector<4x18x18xf32> to vector<1x16x16xf32>
    %155 = vector.shape_cast %154 : vector<1x16x16xf32> to vector<16x16xf32>
    %156 = vector.broadcast %153 : f32 to vector<16x16xf32>
    %157 = arith.mulf %156, %155 : vector<16x16xf32>
    %158 = arith.addf %152, %157 : vector<16x16xf32>
    %c26 = arith.constant 26 : index
    %159 = memref.load %arg1[%c26] : memref<37xf32, #tpu.memory_space<smem>>
    %160 = vector.extract_strided_slice %1 {offsets = [2, 2, 2], sizes = [1, 16, 16], strides = [1, 1, 1]} : vector<4x18x18xf32> to vector<1x16x16xf32>
    %161 = vector.shape_cast %160 : vector<1x16x16xf32> to vector<16x16xf32>
    %162 = vector.broadcast %159 : f32 to vector<16x16xf32>
    %163 = arith.mulf %162, %161 : vector<16x16xf32>
    %164 = arith.addf %158, %163 : vector<16x16xf32>
    %c27 = arith.constant 27 : index
    %165 = memref.load %arg1[%c27] : memref<37xf32, #tpu.memory_space<smem>>
    %166 = vector.extract_strided_slice %1 {offsets = [3, 0, 0], sizes = [1, 16, 16], strides = [1, 1, 1]} : vector<4x18x18xf32> to vector<1x16x16xf32>
    %167 = vector.shape_cast %166 : vector<1x16x16xf32> to vector<16x16xf32>
    %168 = vector.broadcast %165 : f32 to vector<16x16xf32>
    %169 = arith.mulf %168, %167 : vector<16x16xf32>
    %170 = arith.addf %164, %169 : vector<16x16xf32>
    %c28 = arith.constant 28 : index
    %171 = memref.load %arg1[%c28] : memref<37xf32, #tpu.memory_space<smem>>
    %172 = vector.extract_strided_slice %1 {offsets = [3, 0, 1], sizes = [1, 16, 16], strides = [1, 1, 1]} : vector<4x18x18xf32> to vector<1x16x16xf32>
    %173 = vector.shape_cast %172 : vector<1x16x16xf32> to vector<16x16xf32>
    %174 = vector.broadcast %171 : f32 to vector<16x16xf32>
    %175 = arith.mulf %174, %173 : vector<16x16xf32>
    %176 = arith.addf %170, %175 : vector<16x16xf32>
    %c29 = arith.constant 29 : index
    %177 = memref.load %arg1[%c29] : memref<37xf32, #tpu.memory_space<smem>>
    %178 = vector.extract_strided_slice %1 {offsets = [3, 0, 2], sizes = [1, 16, 16], strides = [1, 1, 1]} : vector<4x18x18xf32> to vector<1x16x16xf32>
    %179 = vector.shape_cast %178 : vector<1x16x16xf32> to vector<16x16xf32>
    %180 = vector.broadcast %177 : f32 to vector<16x16xf32>
    %181 = arith.mulf %180, %179 : vector<16x16xf32>
    %182 = arith.addf %176, %181 : vector<16x16xf32>
    %c30 = arith.constant 30 : index
    %183 = memref.load %arg1[%c30] : memref<37xf32, #tpu.memory_space<smem>>
    %184 = vector.extract_strided_slice %1 {offsets = [3, 1, 0], sizes = [1, 16, 16], strides = [1, 1, 1]} : vector<4x18x18xf32> to vector<1x16x16xf32>
    %185 = vector.shape_cast %184 : vector<1x16x16xf32> to vector<16x16xf32>
    %186 = vector.broadcast %183 : f32 to vector<16x16xf32>
    %187 = arith.mulf %186, %185 : vector<16x16xf32>
    %188 = arith.addf %182, %187 : vector<16x16xf32>
    %c31 = arith.constant 31 : index
    %189 = memref.load %arg1[%c31] : memref<37xf32, #tpu.memory_space<smem>>
    %190 = vector.extract_strided_slice %1 {offsets = [3, 1, 1], sizes = [1, 16, 16], strides = [1, 1, 1]} : vector<4x18x18xf32> to vector<1x16x16xf32>
    %191 = vector.shape_cast %190 : vector<1x16x16xf32> to vector<16x16xf32>
    %192 = vector.broadcast %189 : f32 to vector<16x16xf32>
    %193 = arith.mulf %192, %191 : vector<16x16xf32>
    %194 = arith.addf %188, %193 : vector<16x16xf32>
    %c32 = arith.constant 32 : index
    %195 = memref.load %arg1[%c32] : memref<37xf32, #tpu.memory_space<smem>>
    %196 = vector.extract_strided_slice %1 {offsets = [3, 1, 2], sizes = [1, 16, 16], strides = [1, 1, 1]} : vector<4x18x18xf32> to vector<1x16x16xf32>
    %197 = vector.shape_cast %196 : vector<1x16x16xf32> to vector<16x16xf32>
    %198 = vector.broadcast %195 : f32 to vector<16x16xf32>
    %199 = arith.mulf %198, %197 : vector<16x16xf32>
    %200 = arith.addf %194, %199 : vector<16x16xf32>
    %c33 = arith.constant 33 : index
    %201 = memref.load %arg1[%c33] : memref<37xf32, #tpu.memory_space<smem>>
    %202 = vector.extract_strided_slice %1 {offsets = [3, 2, 0], sizes = [1, 16, 16], strides = [1, 1, 1]} : vector<4x18x18xf32> to vector<1x16x16xf32>
    %203 = vector.shape_cast %202 : vector<1x16x16xf32> to vector<16x16xf32>
    %204 = vector.broadcast %201 : f32 to vector<16x16xf32>
    %205 = arith.mulf %204, %203 : vector<16x16xf32>
    %206 = arith.addf %200, %205 : vector<16x16xf32>
    %c34 = arith.constant 34 : index
    %207 = memref.load %arg1[%c34] : memref<37xf32, #tpu.memory_space<smem>>
    %208 = vector.extract_strided_slice %1 {offsets = [3, 2, 1], sizes = [1, 16, 16], strides = [1, 1, 1]} : vector<4x18x18xf32> to vector<1x16x16xf32>
    %209 = vector.shape_cast %208 : vector<1x16x16xf32> to vector<16x16xf32>
    %210 = vector.broadcast %207 : f32 to vector<16x16xf32>
    %211 = arith.mulf %210, %209 : vector<16x16xf32>
    %212 = arith.addf %206, %211 : vector<16x16xf32>
    %c35 = arith.constant 35 : index
    %213 = memref.load %arg1[%c35] : memref<37xf32, #tpu.memory_space<smem>>
    %214 = vector.extract_strided_slice %1 {offsets = [3, 2, 2], sizes = [1, 16, 16], strides = [1, 1, 1]} : vector<4x18x18xf32> to vector<1x16x16xf32>
    %215 = vector.shape_cast %214 : vector<1x16x16xf32> to vector<16x16xf32>
    %216 = vector.broadcast %213 : f32 to vector<16x16xf32>
    %217 = arith.mulf %216, %215 : vector<16x16xf32>
    %218 = arith.addf %212, %217 : vector<16x16xf32>
    %c36 = arith.constant 36 : index
    %219 = memref.load %arg1[%c36] : memref<37xf32, #tpu.memory_space<smem>>
    %220 = vector.broadcast %219 : f32 to vector<16x16xf32>
    %221 = arith.addf %218, %220 : vector<16x16xf32>
    %c0_4 = arith.constant 0 : index
    %c0_5 = arith.constant 0 : index
    %c0_6 = arith.constant 0 : index
    %222 = vector.load %arg3[%c0_4, %c0_5, %c0_6] : memref<1x16x16xf32, #tpu.memory_space<vmem>>, vector<1x16x16xf32>
    %223 = vector.shape_cast %222 : vector<1x16x16xf32> to vector<16x16xf32>
    %224 = vector.shape_cast %221 : vector<16x16xf32> to vector<1x16x16xf32>
    tpu.vector_store %arg3[%c0_4, %c0_5, %c0_6], %224 {strides = array<i32>} : memref<1x16x16xf32, #tpu.memory_space<vmem>>, vector<1x16x16xf32>,
    %225 = vector.shape_cast %221 : vector<16x16xf32> to vector<1x16x16xf32>
    %cst_7 = arith.constant dense<0x7F800000> : vector<1xf32>
    %226 = vector.multi_reduction <minimumf>, %225, %cst_7 [1, 2] : vector<1x16x16xf32> to vector<1xf32>
    %227 = vector.shape_cast %226 : vector<1xf32> to vector<1x1x1xf32>
    %228 = vector.extract %227[0, 0, 0] : f32 from vector<1x1x1xf32>
    %229 = arith.index_cast %arg0 : i32 to index
    %c0_8 = arith.constant 0 : index
    %230 = memref.load %arg4[%229, %c0_8] : memref<2x4xf32, #tpu.memory_space<smem>>
    memref.store %228, %arg4[%229, %c0_8] : memref<2x4xf32, #tpu.memory_space<smem>>
    %231 = vector.shape_cast %221 : vector<16x16xf32> to vector<1x16x16xf32>
    %cst_9 = arith.constant dense<0xFF800000> : vector<1xf32>
    %232 = vector.multi_reduction <maximumf>, %231, %cst_9 [1, 2] : vector<1x16x16xf32> to vector<1xf32>
    %233 = vector.shape_cast %232 : vector<1xf32> to vector<1x1x1xf32>
    %234 = vector.extract %233[0, 0, 0] : f32 from vector<1x1x1xf32>
    %235 = arith.index_cast %arg0 : i32 to index
    %c1_10 = arith.constant 1 : index
    %236 = memref.load %arg4[%235, %c1_10] : memref<2x4xf32, #tpu.memory_space<smem>>
    memref.store %234, %arg4[%235, %c1_10] : memref<2x4xf32, #tpu.memory_space<smem>>
    %237 = vector.shape_cast %221 : vector<16x16xf32> to vector<1x16x16xf32>
    %cst_11 = arith.constant dense<0.000000e+00> : vector<1xf32>
    %238 = vector.multi_reduction <add>, %237, %cst_11 [1, 2] : vector<1x16x16xf32> to vector<1xf32>
    %239 = vector.shape_cast %238 : vector<1xf32> to vector<1x1x1xf32>
    %240 = vector.extract %239[0, 0, 0] : f32 from vector<1x1x1xf32>
    %241 = arith.index_cast %arg0 : i32 to index
    %c2_12 = arith.constant 2 : index
    %242 = memref.load %arg4[%241, %c2_12] : memref<2x4xf32, #tpu.memory_space<smem>>
    memref.store %240, %arg4[%241, %c2_12] : memref<2x4xf32, #tpu.memory_space<smem>>
    %243 = arith.mulf %221, %221 : vector<16x16xf32>
    %244 = vector.shape_cast %243 : vector<16x16xf32> to vector<1x16x16xf32>
    %cst_13 = arith.constant dense<0.000000e+00> : vector<1xf32>
    %245 = vector.multi_reduction <add>, %244, %cst_13 [1, 2] : vector<1x16x16xf32> to vector<1xf32>
    %246 = vector.shape_cast %245 : vector<1xf32> to vector<1x1x1xf32>
    %247 = vector.extract %246[0, 0, 0] : f32 from vector<1x1x1xf32>
    %248 = arith.index_cast %arg0 : i32 to index
    %c3_14 = arith.constant 3 : index
    %249 = memref.load %arg4[%248, %c3_14] : memref<2x4xf32, #tpu.memory_space<smem>>
    memref.store %247, %arg4[%248, %c3_14] : memref<2x4xf32, #tpu.memory_space<smem>>
    return
  }
  func.func @transform_0(%arg0: i32) -> i32 {
    %c0_i32 = arith.constant 0 : i32
    %c0_i32_0 = arith.constant 0 : i32
    return %c0_i32 : i32
  }
  func.func @transform_1(%arg0: i32) -> (i32, i32, i32, i32) {
    %c0_i32 = arith.constant 0 : i32
    %c0_i32_0 = arith.constant 0 : i32
    %c0_i32_1 = arith.constant 0 : i32
    %c0_i32_2 = arith.constant 0 : i32
    return %arg0, %c0_i32, %c0_i32_0, %c0_i32_1 : i32, i32, i32, i32
  }
  func.func @transform_2(%arg0: i32) -> (i32, i32, i32) {
    %c0_i32 = arith.constant 0 : i32
    %c0_i32_0 = arith.constant 0 : i32
    %c0_i32_1 = arith.constant 0 : i32
    return %arg0, %c0_i32, %c0_i32_0 : i32, i32, i32
  }
  func.func @transform_3(%arg0: i32) -> (i32, i32) {
    %c0_i32 = arith.constant 0 : i32
    %c0_i32_0 = arith.constant 0 : i32
    %c0_i32_1 = arith.constant 0 : i32
    return %c0_i32, %c0_i32_0 : i32, i32
  }
}

</mosaic_0001>

<bundles_post_ra>
// kernel: tpu_custom_call.1
= control target key start
LH: loop header
LB: loop body
LE: loop exit
PB: predicated region body
PF: predicated region fallthrough
CT: control target
= control target key end

     0   :  { %9 = vsyncpa [#allocation5], 0  ;;  %s1777_s0 = inlined_call_operand.vmem [shape: f32[37], index: 0, kind: input, shape index: {}]   ;;  %s1778_s1 = inlined_call_operand.vmem [shape: f32[2,4,18,18], index: 1, kind: input, shape index: {}]   ;;  %s1779_s2 = inlined_call_operand.hbm [shape: f32[2,16,16], index: 2, kind: output, shape index: {0}]   ;;  %s1780_s3 = inlined_call_operand.hbm [shape: f32[2,4], index: 3, kind: output, shape index: {1}]  }
   0x1   :  { %10 = vsyncpa [#allocation3], 0 }
   0x2   :  { %12 = vsyncpa [#allocation3 + $0x1], 0 }
   0x3   :  { %13 = vsyncpa [#allocation4], 0  ;;  %s1247_s12 = smov 0   ;;  %s1249_s13 = smov 0  }
   0x4   :  { %s1251_s14 = smov 0   ;;  %s1253_s15 = smov 0  }
   0x5 LB: > { %s1268_s16 = sadd.s32 4294967295, %s1218_s15   ;;  %s995_s17 = sadd.s32 4294967294, %s1218_s15   ;;  %s1218_s15 = sphi %s1253_s15, %s1792_s15   ;;  %s1214_s14 = sphi %s1251_s14, %s1791_s14   ;;  %s1210_s13 = sphi %s1249_s13, %s1790_s13   ;;  %s1206_s12 = sphi %s1247_s12, %s1789_s12  }
   0x6   : > { %s1272_s18 = sadd.s32 1, %s1218_s15   ;;  %s73_s19 = sadd.s32 1, %s1214_s14 }
   0x7   : > { %s70_s20 = ssub.s32 %s1218_s15, %s1272_s18  ;;  %p83_p0 = scmp.ne.s32.totalorder %s1214_s14, %s1210_s13 }
   0x8   : > { %p71_p1 = scmp.eq.s32.totalorder %s70_s20, 0  ;;  %p1781_p2 = scmp.eq.s32.totalorder %s1268_s16, 1 }
   0x9   : > { %p89_p3 = scmp.ne.s32.totalorder %s1210_s13, %s1206_s12  ;;  %p90_p4 = scmp.eq.s32.totalorder %s995_s17, 1 }
   0xa   : > { %s1283_s21 = scalar_select %p71_p1, %s1214_s14, %s73_s19  }
   0xb   : > { %p1287_p5 = por %p1781_p2, %p83_p0  ;;  %p1291_p6 = por %p90_p4, %p89_p3 }
   0xc   : > { %p996_p7 = scmp.ge.s32.totalorder %s1218_s15, 1  ;;  %p118_p8 = scmp.lt.s32.totalorder %s1218_s15, 3 }
   0xd   : > { %p1078_p9 = scmp.eq.s32.totalorder %s1268_s16, 0  ;;  %s131_s27 = sshll.u32 %s1777_s0, 4  ;;  %s132_s27 = int_to_ptr.vmem [resolvable:$true] %s131_s27 }
   0xe   : > { %p1298_p10 = pnand %p996_p7, %p118_p8  ;;  %s1121_s28 = scalar_lea.vmem %s132_s27, 16 }
   0xf   : > { %p1122_p13 = scmp.ne.s32.totalorder %s132_s27, %s1121_s28  ;;  %p1129_p4 = scmp.lt.s32.totalorder %s132_s27, %s132_s27 }
  0x10   : > { %p1070_p11 = pneg %p1298_p10  ;;  %p1130_p7 = scmp.lt.s32.totalorder %s1121_s28, %s1121_s28 }
  0x12   : > { %p1071_p12 = pnand %p1078_p9, %p1070_p11  ;;  %p1131_p8 = por %p1130_p7, %p1129_p4 }
  0x14   : > { %p1123_p0 = pneg %p1071_p12 }
  0x16   : > { %p1124_p1 = pnand %p1123_p0, %p1122_p13 }
  0x18   : > { %p1125_p3 = pneg %p1124_p1 }
  0x1a   : > { %p1132_p2 = pnand %p1131_p8, %p1125_p3 }
  0x1c   : > { %1135 = shalt.err (!%p1132_p2)
}
  0x1d   : > { %s1220_s29 = smov [#allocation2]   ;;  %152 = sbr.rel (%p1298_p10) target bundleno = 485 (0x1e5), region = 28 }
  0x1e   : > { %1073 = dma.vmem_to_smem (!%p1071_p12), %s132_s27, 16, %s1220_s29, [#allocation5]  }
  0x24   : > { %1193 = dma.done.wait (%p1078_p9), [#allocation5], 16  }
  0x25   : > { %1195 = vsyncadd (%p1078_p9), [#allocation5], 4294967280 }
  0x26   : > { %158 = sfence }
  0x27   : > { %p177_p11 = scmp.lt.s32.totalorder %s1268_s16, 1  ;;  %s1004_s30 = sld [smem:[#allocation2 + $0x2]]  ;;  %vm236_vm0 = vcmask 1046528   ;;  %vm296_vm1 = vcmask 1045504   ;;  %vm808_vm2 = vcmask 130048  }
  0x28   : > { %s1003_s4 = sld [smem:[#allocation2 + $0x1]]  ;;  %s1006_s6 = sld [smem:[#allocation2 + $0x4]] }
  0x29   : > { %s178_s5 = scalar_select %p177_p11, %s1268_s16, 1 }
  0x2a   : > { %s1007_s8 = sld [smem:[#allocation2 + $0x5]]  ;;  %s1009_s9 = sld [smem:[#allocation2 + $0x7]] }
  0x2b   : > { %s1051_s7 = smul.u32 96, %s178_s5  ;;  %s1010_s19 = sld [smem:[#allocation2 + $0x8]] }
  0x2c   : > { %s1221_s20 = smov 126   ;;  %s1222_s24 = smov 127  }
  0x2d   : > { %s1320_s17 = scalar_lea.vmem %s1778_s1, %s1051_s7  ;;  %v215_v0 = vstv %s1004_s30  ;;  %s1354_s25 = sld [smem:[#allocation2 + $0xa]] }
  0x2e   : > { %v1323_v1 = vld [vmem:[%s1320_s17] sm:$0xff]  ;;  %v1326_v2 = vld [vmem:[%s1320_s17 + $0x8] sm:$0xff]  ;;  %v201_v3 = vstv %s1003_s4  ;;  %v1329_v4 = vld [vmem:[%s1320_s17 + $0x10] sm:$0x3]  ;;  %s1015_s26 = sld [smem:[#allocation2 + $0xd]]  ;;  %s1016_s27 = sld [smem:[#allocation2 + $0xe]] }
  0x2f   : > { %v216_v5 = vmul.f32 %v215_v0, %v1323_v1  ;;  %v202_v6 = vmul.f32 %v201_v3, %v1323_v1  ;;  %v217_v7 = vmul.f32 %v215_v0, %v1326_v2  ;;  %v203_v8 = vmul.f32 %v201_v3, %v1326_v2  ;;  %s1018_s28 = sld [smem:[#allocation2 + $0x10]]  ;;  %s1362_s29 = sld [smem:[#allocation2 + $0xb]]  ;;  %v1368_v43 = vld [vmem:[%s1320_s17 + $0x20] sm:$0xff]  ;;  %v1374_v47 = vld [vmem:[%s1320_s17 + $0x18] sm:$0xff]  ;;  %v1377_v48 = vld [vmem:[%s1320_s17 + $0x28] sm:$0x3] }
  0x30   : > { %v247_v9 = vstv %s1006_s6  ;;  %v268_v13 = vstv %s1007_s8  ;;  %v307_v17 = vstv %s1009_s9  ;;  %s1019_s30 = sld [smem:[#allocation2 + $0x11]]  ;;  %s1386_s4 = sld [smem:[#allocation2 + $0x13]] }
  0x31   : > { %220 = vrot.lane.b32.xlu1 %v216_v5, %s1221_s20  ;;  %206 = vrot.lane.b32.xlu0 %v202_v6, %s1222_s24  ;;  %v249_v10 = vmul.f32 %v247_v9, %v1326_v2  ;;  %v250_v11 = vmul.f32 %v247_v9, %v1329_v4  ;;  %v248_v12 = vmul.f32 %v247_v9, %v1323_v1  ;;  %v328_v29 = vstv %s1010_s19  ;;  %s1395_s5 = sld [smem:[#allocation2 + $0x1f]]  ;;  %s1397_s6 = sld [smem:[#allocation2 + $0x20]] }
  0x32   : > { %v270_v14 = vmul.f32 %v268_v13, %v1326_v2  ;;  %v271_v15 = vmul.f32 %v268_v13, %v1329_v4  ;;  %v269_v16 = vmul.f32 %v268_v13, %v1323_v1  ;;  %v309_v21 = vmul.f32 %v307_v17, %v1326_v2  ;;  %s1403_s7 = sld [smem:[#allocation2 + $0x16]]  ;;  %s1406_s8 = sld [smem:[#allocation2 + $0x14]] }
  0x33   : > { %v255_v18 = vrot.slane %v249_v10, 1  ;;  %v257_v19 = vrot.slane %v250_v11, 1  ;;  %v254_v20 = vrot.slane %v248_v12, 1  ;;  %v310_v25 = vmul.f32 %v307_v17, %v1329_v4  ;;  %s1415_s9 = sld [smem:[#allocation2 + $0x17]]  ;;  %s1433_s10 = sld [smem:[#allocation2 + $0x19]] }
  0x34   : > { %v276_v22 = vrot.slane %v270_v14, 1  ;;  %v278_v23 = vrot.slane %v271_v15, 1  ;;  %v275_v24 = vrot.slane %v269_v16, 1  ;;  %v308_v28 = vmul.f32 %v307_v17, %v1323_v1  ;;  %v1412_v17 = vld [vmem:[%s1320_s17 + $0x38] sm:$0xff]  ;;  %s1440_s11 = sld [smem:[#allocation2 + $0x3]]  ;;  %s1454_s19 = sld [smem:[#allocation2 + $0x6]] }
  0x35   : > { %222 = vrot.lane.b32.xlu1 %v217_v7, %s1221_s20  ;;  %208 = vrot.lane.b32.xlu0 %v203_v8, %s1222_s24  ;;  %v258_v26 = vsel %vm236_vm0, %v255_v18, %v257_v19  ;;  %v256_v27 = vsel %vm236_vm0, %v254_v20, %v255_v18  ;;  %v315_v32 = vrot.slane %v309_v21, 2  ;;  %v317_v33 = vrot.slane %v310_v25, 2 }
  0x36   : > { %v279_v30 = vsel %vm236_vm0, %v276_v22, %v278_v23  ;;  %v277_v31 = vsel %vm236_vm0, %v275_v24, %v276_v22  ;;  %v314_v34 = vrot.slane %v308_v28, 2  ;;  %v330_v35 = vmul.f32 %v328_v29, %v1326_v2  ;;  %v1422_v23 = vld [vmem:[%s1320_s17 + $0x58] sm:$0x3]  ;;  %v1428_v28 = vld [vmem:[%s1320_s17 + $0x50] sm:$0xff] }
  0x37   : > { %v331_v36 = vmul.f32 %v328_v29, %v1329_v4  ;;  %v329_v37 = vmul.f32 %v328_v29, %v1323_v1  ;;  %v318_v38 = vsel %vm296_vm1, %v315_v32, %v317_v33  ;;  %v355_v44 = vstv %s1354_s25  ;;  %s1499_s25 = sld [smem:[#allocation2 + $0xf]] }
  0x38   : > { %v316_v39 = vsel %vm296_vm1, %v314_v34, %v315_v32  ;;  %v336_v40 = vrot.slane %v330_v35, 2  ;;  %v400_v49 = vstv %s1015_s26  ;;  %v421_v50 = vstv %s1016_s27  ;;  %s1516_s26 = sld [smem:[#allocation2 + $0x15]]  ;;  %s1524_s27 = sld [smem:[#allocation2 + $0x18]] }
  0x39   : > { %261 = vrot.lane.b32.xlu1 %v258_v26, %s1222_s24  ;;  %259 = vrot.lane.b32.xlu0 %v256_v27, %s1222_s24  ;;  %v338_v41 = vrot.slane %v331_v36, 2  ;;  %v335_v42 = vrot.slane %v329_v37, 2  ;;  %v357_v51 = vmul.f32 %v355_v44, %v1368_v43  ;;  %v459_v52 = vstv %s1018_s28  ;;  %s1534_s28 = sld [smem:[#allocation2 + $0x1a]] }
  0x3a   : > { %v356_v53 = vmul.f32 %v355_v44, %v1374_v47  ;;  %v369_v54 = vstv %s1362_s29  ;;  %v402_v55 = vmul.f32 %v400_v49, %v1368_v43  ;;  %v403_v56 = vmul.f32 %v400_v49, %v1377_v48  ;;  %v1457_v44 = vld [vmem:[%s1320_s17 + $0x30] sm:$0xff]  ;;  %s1032_s29 = sld [smem:[#allocation2 + $0x1e]] }
  0x3b   : > { %v339_v45 = vsel %vm296_vm1, %v336_v40, %v338_v41  ;;  %v337_v46 = vsel %vm296_vm1, %v335_v42, %v336_v40  ;;  %v401_v57 = vmul.f32 %v400_v49, %v1374_v47  ;;  %v423_v58 = vmul.f32 %v421_v50, %v1368_v43 }
  0x3c   : > { %v424_v59 = vmul.f32 %v421_v50, %v1377_v48  ;;  %v422_v60 = vmul.f32 %v421_v50, %v1374_v47  ;;  %v461_v61 = vmul.f32 %v459_v52, %v1368_v43  ;;  %v462_v62 = vmul.f32 %v459_v52, %v1377_v48 }
  0x3d   : > { %282 = vrot.lane.b32.xlu1 %v279_v30, %s1221_s20  ;;  %280 = vrot.lane.b32.xlu0 %v277_v31, %s1221_s20  ;;  %v460_v63 = vmul.f32 %v459_v52, %v1374_v47  ;;  %v480_v0 = vstv %s1019_s30  ;;  %v371_v3 = vmul.f32 %v369_v54, %v1368_v43  ;;  %v370_v5 = vmul.f32 %v369_v54, %v1374_v47  ;;  %v1436_v31 = vld [vmem:[%s1320_s17 + $0x48] sm:$0xff]  ;;  %s1592_s30 = sld [smem:[#allocation2 + $0x1c]] }
  0x3e   : > { %v408_v6 = vrot.slane %v402_v55, 1  ;;  %v410_v7 = vrot.slane %v403_v56, 1  ;;  %v407_v8 = vrot.slane %v401_v57, 1  ;;  %v429_v9 = vrot.slane %v423_v58, 1 }
  0x3f   : > { %v431_v10 = vrot.slane %v424_v59, 1  ;;  %v428_v11 = vrot.slane %v422_v60, 1  ;;  %v467_v12 = vrot.slane %v461_v61, 2  ;;  %v469_v13 = vrot.slane %v462_v62, 2 }
  0x40   : > { %v466_v14 = vrot.slane %v460_v63, 2  ;;  %v482_v15 = vmul.f32 %v480_v0, %v1368_v43  ;;  %v483_v16 = vmul.f32 %v480_v0, %v1377_v48  ;;  %v507_v18 = vstv %s1386_s4  ;;  %s1609_s4 = sld [smem:[#allocation2 + $0x1d]] }
  0x41   : > { %321 = vrot.lane.b32.xlu1 %v318_v38, %s1222_s24  ;;  %319 = vrot.lane.b32.xlu0 %v316_v39, %s1222_s24  ;;  %v411_v19 = vsel %vm236_vm0, %v408_v6, %v410_v7  ;;  %v409_v20 = vsel %vm236_vm0, %v407_v8, %v408_v6  ;;  %v432_v21 = vsel %vm236_vm0, %v429_v9, %v431_v10  ;;  %v704_v32 = vstv %s1395_s5  ;;  %v1449_v39 = vld [vmem:[%s1320_s17 + $0x40] sm:$0x3]  ;;  %s1473_s17 = sld [smem:[#allocation2 + $0xc]]  ;;  %s1035_s5 = sld [smem:[#allocation2 + $0x21]] }
  0x42   : > { %v481_v22 = vmul.f32 %v480_v0, %v1374_v47  ;;  %v430_v24 = vsel %vm236_vm0, %v428_v11, %v429_v9  ;;  %v470_v25 = vsel %vm296_vm1, %v467_v12, %v469_v13  ;;  %v468_v26 = vsel %vm296_vm1, %v466_v14, %v467_v12 }
  0x43   : > { %v488_v27 = vrot.slane %v482_v15, 2  ;;  %v490_v29 = vrot.slane %v483_v16, 2  ;;  %v1431_v30 = vmul.f32 %v507_v18, %v1412_v17  ;;  %v725_v33 = vstv %s1397_s6  ;;  %s1036_s6 = sld [smem:[#allocation2 + $0x22]] }
  0x44   : > { %v552_v34 = vstv %s1403_s7  ;;  %v706_v35 = vmul.f32 %v704_v32, %v1428_v28  ;;  %v707_v36 = vmul.f32 %v704_v32, %v1422_v23  ;;  %v705_v37 = vmul.f32 %v704_v32, %v1436_v31  ;;  %s1037_s7 = sld [smem:[#allocation2 + $0x23]] }
  0x45   : > { %342 = vrot.lane.b32.xlu1 %v339_v45, %s1221_s20  ;;  %340 = vrot.lane.b32.xlu0 %v337_v46, %s1221_s20  ;;  %v487_v38 = vrot.slane %v481_v22, 2  ;;  %v727_v40 = vmul.f32 %v725_v33, %v1428_v28  ;;  %v728_v41 = vmul.f32 %v725_v33, %v1422_v23  ;;  %v726_v42 = vmul.f32 %v725_v33, %v1436_v31 }
  0x46   : > { %v521_v45 = vstv %s1406_s8  ;;  %v712_v46 = vrot.slane %v706_v35, 1  ;;  %v714_v49 = vrot.slane %v707_v36, 1  ;;  %v711_v50 = vrot.slane %v705_v37, 1  ;;  %s194_s8 = sld [smem:[#allocation2]] }
  0x47   : > { %v733_v52 = vrot.slane %v727_v40, 1  ;;  %v732_v54 = vrot.slane %v726_v42, 1  ;;  %v555_v55 = vmul.f32 %v552_v34, %v1449_v39  ;;  %v573_v56 = vstv %s1415_s9  ;;  %s1029_s9 = sld [smem:[#allocation2 + $0x1b]] }
  0x48   : > { %v1468_v57 = vsel %vm236_vm0, %v712_v46, %v714_v49  ;;  %v1471_v58 = vsel %vm236_vm0, %v711_v50, %v712_v46  ;;  %v508_v59 = vmul.f32 %v507_v18, %v1457_v44  ;;  %v553_v60 = vmul.f32 %v552_v34, %v1457_v44 }
  0x49   : > { %362 = vrot.lane.b32.xlu1 %v357_v51, %s1222_s24  ;;  %360 = vrot.lane.b32.xlu0 %v356_v53, %s1222_s24  ;;  %v1461_v51 = vmul.f32 %v552_v34, %v1412_v17  ;;  %v735_v53 = vrot.slane %v728_v41, 1  ;;  %v1481_v62 = vsel %vm236_vm0, %v732_v54, %v733_v52  ;;  %v491_v63 = vsel %vm296_vm1, %v488_v27, %v490_v29 }
  0x4a   : > { %v489_v0 = vsel %vm296_vm1, %v487_v38, %v488_v27  ;;  %v1492_v6 = vmul.f32 %v573_v56, %v1412_v17  ;;  %v1495_v7 = vmul.f32 %v573_v56, %v1449_v39  ;;  %v611_v8 = vstv %s1433_s10  ;;  %s1038_s10 = sld [smem:[#allocation2 + $0x24]] }
  0x4b   : > { %v1478_v61 = vsel %vm236_vm0, %v733_v52, %v735_v53  ;;  %v229_v9 = vstv %s1440_s11  ;;  %v560_v10 = vrot.slane %v1461_v51, 1  ;;  %v562_v11 = vrot.slane %v555_v55, 1  ;;  %s172_s11 = sand.u32 1, %s1210_s13  }
  0x4c   : > { %v1505_v12 = vmul.f32 %v573_v56, %v1457_v44  ;;  %v231_v13 = vmul.f32 %v229_v9, %v1326_v2  ;;  %v559_v14 = vrot.slane %v553_v60, 1  ;;  %v232_v15 = vmul.f32 %v229_v9, %v1329_v4 }
  0x4d   : > { %376 = vrot.lane.b32.xlu1 %v371_v3, %s1221_s20  ;;  %374 = vrot.lane.b32.xlu0 %v370_v5, %s1221_s20  ;;  %v1486_v3 = vmul.f32 %v521_v45, %v1412_v17  ;;  %v1489_v5 = vmul.f32 %v521_v45, %v1457_v44  ;;  %v230_v16 = vmul.f32 %v229_v9, %v1323_v1  ;;  %v289_v18 = vstv %s1454_s19  ;;  %s1001_s19 = sshll.u32 %s172_s11, 4 }
  0x4e   : > { %v292_v22 = vmul.f32 %v289_v18, %v1329_v4  ;;  %v290_v27 = vmul.f32 %v289_v18, %v1323_v1  ;;  %v583_v29 = vrot.slane %v1495_v7, 1  ;;  %v383_v34 = vstv %s1473_s17  ;;  %s174_s17 = scalar_lea.vmem [#allocation6], %s1001_s19 }
  0x4f   : > { %v580_v4 = vrot.slane %v1505_v12, 1  ;;  %v614_v38 = vmul.f32 %v611_v8, %v1449_v39  ;;  %v385_v41 = vmul.f32 %v383_v34, %v1368_v43  ;;  %v386_v42 = vmul.f32 %v383_v34, %v1377_v48 }
  0x50   : > { %v300_v33 = vrot.slane %v292_v22, 2  ;;  %v297_v37 = vrot.slane %v290_v27, 2  ;;  %v563_v45 = vsel %vm236_vm0, %v560_v10, %v562_v11  ;;  %v384_v49 = vmul.f32 %v383_v34, %v1374_v47 }
  0x51   : > { %414 = vrot.lane.b32.xlu1 %v411_v19, %s1222_s24  ;;  %412 = vrot.lane.b32.xlu0 %v409_v20, %s1222_s24  ;;  %v1512_v19 = vmul.f32 %v611_v8, %v1412_v17  ;;  %v238_v20 = vrot.slane %v231_v13, 1  ;;  %v442_v50 = vstv %s1499_s25  ;;  %v391_v51 = vrot.slane %v385_v41, 1  ;;  %s1050_s25 = sshll.u32 %s1268_s16, 8 }
  0x52   : > { %v393_v52 = vrot.slane %v386_v42, 1  ;;  %v444_v53 = vmul.f32 %v442_v50, %v1368_v43  ;;  %v445_v54 = vmul.f32 %v442_v50, %v1377_v48  ;;  %v561_v55 = vsel %vm236_vm0, %v559_v14, %v560_v10 }
  0x53   : > { %v619_v56 = vrot.slane %v1512_v19, 2  ;;  %v390_v60 = vrot.slane %v384_v49, 1  ;;  %v612_v12 = vmul.f32 %v611_v8, %v1457_v44 }
  0x54   : > { %v452_v7 = vrot.slane %v445_v54, 2 }
  0x55   : > { %435 = vrot.lane.b32.xlu1 %v432_v21, %s1221_s20  ;;  %433 = vrot.lane.b32.xlu0 %v430_v24, %s1221_s20  ;;  %v291_v21 = vmul.f32 %v289_v18, %v1326_v2  ;;  %v581_v24 = vrot.slane %v1492_v6, 1  ;;  %v1560_v9 = vsel %vm236_vm0, %v390_v60, %v391_v51 }
  0x57   : > { %v298_v32 = vrot.slane %v291_v21, 2  ;;  %v584_v22 = vsel %vm236_vm0, %v581_v24, %v583_v29 }
  0x59   : > { %473 = vrot.lane.b32.xlu1 %v470_v25, %s1222_s24  ;;  %471 = vrot.lane.b32.xlu0 %v468_v26, %s1222_s24  ;;  %v240_v25 = vrot.slane %v232_v15, 1  ;;  %v237_v26 = vrot.slane %v230_v16, 1  ;;  %v1537_v40 = vsel %vm296_vm1, %v298_v32, %v300_v33  ;;  %v1543_v46 = vsel %vm296_vm1, %v297_v37, %v298_v32 }
  0x5a   : > { %v594_v15 = vstv %s1524_s27  ;;  %v582_v32 = vsel %vm236_vm0, %v580_v4, %v581_v24  ;;  %v618_v37 = vrot.slane %v612_v12, 2  ;;  %v687_v4 = vstv %s1032_s29  ;;  %s887_s29 = sshll.u32 %s174_s17, 4  ;;  %s1711_s29 = int_to_ptr.vmem [resolvable:$true] %s887_s29 }
  0x5b   : > { %v1528_v35 = vsel %vm236_vm0, %v238_v20, %v240_v25  ;;  %v1531_v36 = vsel %vm236_vm0, %v237_v26, %v238_v20  ;;  %v596_v20 = vmul.f32 %v594_v15, %v1412_v17  ;;  %v595_v8 = vmul.f32 %v594_v15, %v1457_v44 }
  0x5c   : > { %v621_v25 = vrot.slane %v614_v38, 2  ;;  %v690_v49 = vmul.f32 %v687_v4, %v1422_v23  ;;  %v746_v12 = vstv %s1035_s5  ;;  %s1223_s5 = smov [#allocation6]  }
  0x5d   : > { %494 = vrot.lane.b32.xlu1 %v491_v63, %s1221_s20  ;;  %492 = vrot.lane.b32.xlu0 %v489_v0, %s1221_s20  ;;  %v443_v63 = vmul.f32 %v442_v50, %v1374_v47  ;;  %v1556_v0 = vsel %vm236_vm0, %v391_v51, %v393_v52  ;;  %v602_v27 = vrot.slane %v596_v20, 2  ;;  %v601_v29 = vrot.slane %v595_v8, 2 }
  0x5e   : > { %v622_v24 = vsel %vm296_vm1, %v619_v56, %v621_v25  ;;  %v688_v50 = vmul.f32 %v687_v4, %v1436_v31  ;;  %v620_v51 = vsel %vm296_vm1, %v618_v37, %v619_v56  ;;  %v697_v60 = vrot.slane %v690_v49, 1 }
  0x5f   : > { %v449_v11 = vrot.slane %v443_v63, 2  ;;  %v1604_v6 = vsel %vm296_vm1, %v601_v29, %v602_v27  ;;  %v784_v37 = vstv %s1037_s7 }
  0x60   : > { %v694_v63 = vrot.slane %v688_v50, 1 }
  0x61   : > { %514 = vrot.lane.b32.xlu1 %v1431_v30, %s1222_s24  ;;  %512 = vrot.lane.b32.xlu0 %v508_v59, %s1222_s24  ;;  %v450_v30 = vrot.slane %v444_v53, 2  ;;  %v535_v59 = vstv %s1516_s26 }
  0x62   : > { %v537_v48 = vmul.f32 %v535_v59, %v1412_v17  ;;  %v538_v10 = vmul.f32 %v535_v59, %v1449_v39  ;;  %v536_v14 = vmul.f32 %v535_v59, %v1457_v44 }
  0x63   : > { %v1570_v13 = vsel %vm296_vm1, %v450_v30, %v452_v7  ;;  %v1575_v16 = vsel %vm296_vm1, %v449_v11, %v450_v30  ;;  %v659_v30 = vstv %s1592_s30  ;;  %s1715_s30 = scalar_lea.sflag [#allocation3], %s172_s11 }
  0x64   : > { %v543_v18 = vrot.slane %v537_v48, 1  ;;  %v545_v19 = vrot.slane %v538_v10, 1  ;;  %v542_v21 = vrot.slane %v536_v14, 1  ;;  %v661_v48 = vmul.f32 %v659_v30, %v1428_v28 }
  0x65   : > { %528 = vrot.lane.b32.xlu1 %v1486_v3, %s1221_s20  ;;  %526 = vrot.lane.b32.xlu0 %v1489_v5, %s1221_s20  ;;  %v632_v3 = vstv %s1534_s28  ;;  %v597_v5 = vmul.f32 %v594_v15, %v1449_v39  ;;  %v660_v10 = vmul.f32 %v659_v30, %v1436_v31  ;;  %v673_v14 = vstv %s1609_s4  ;;  %s1709_s28 = scalar_lea.hbm %s1779_s2, %s1050_s25  ;;  %s1136_s4 = scalar_lea.vmem %s1711_s29, 256 }
  0x66   : > { %v1585_v26 = vsel %vm236_vm0, %v543_v18, %v545_v19  ;;  %v1595_v33 = vsel %vm236_vm0, %v542_v21, %v543_v18  ;;  %v634_v38 = vmul.f32 %v632_v3, %v1412_v17  ;;  %v635_v41 = vmul.f32 %v632_v3, %v1449_v39  ;;  %p1137_p2 = scmp.ne.s32.totalorder %s1711_s29, %s1136_s4 }
  0x67   : > { %v604_v34 = vrot.slane %v597_v5, 2  ;;  %v633_v42 = vmul.f32 %v632_v3, %v1457_v44  ;;  %v689_v39 = vmul.f32 %v687_v4, %v1428_v28  ;;  %v748_v15 = vmul.f32 %v746_v12, %v1428_v28 }
  0x68   : > { %v640_v52 = vrot.slane %v634_v38, 2  ;;  %v642_v53 = vrot.slane %v635_v41, 2  ;;  %v749_v18 = vmul.f32 %v746_v12, %v1422_v23  ;;  %v747_v19 = vmul.f32 %v746_v12, %v1436_v31  ;;  %p1138_p9 = pnand %p1137_p2, %p1287_p5 }
  0x69   : > { %566 = vrot.lane.b32.xlu1 %v563_v45, %s1222_s24  ;;  %564 = vrot.lane.b32.xlu0 %v561_v55, %s1222_s24  ;;  %v1601_v45 = vsel %vm296_vm1, %v602_v27, %v604_v34  ;;  %v639_v54 = vrot.slane %v633_v42, 2  ;;  %v695_v55 = vrot.slane %v689_v39, 1  ;;  %v754_v20 = vrot.slane %v748_v15, 2 }
  0x6a   : > { %v643_v56 = vsel %vm296_vm1, %v640_v52, %v642_v53  ;;  %v756_v3 = vrot.slane %v749_v18, 2  ;;  %v753_v21 = vrot.slane %v747_v19, 2  ;;  %v675_v5 = vmul.f32 %v673_v14, %v1428_v28  ;;  %p1139_p10 = pneg %p1138_p9 }
  0x6b   : > { %v1619_v7 = vsel %vm236_vm0, %v695_v55, %v697_v60  ;;  %v1622_v59 = vsel %vm236_vm0, %v694_v63, %v695_v55  ;;  %v641_v11 = vsel %vm296_vm1, %v639_v54, %v640_v52  ;;  %v674_v8 = vmul.f32 %v673_v14, %v1436_v31 }
  0x6c   : > { %v1642_v25 = vsel %vm296_vm1, %v753_v21, %v754_v20  ;;  %v763_v27 = vstv %s1036_s6  ;;  %v787_v4 = vmul.f32 %v784_v37, %v1422_v23  ;;  %v785_v39 = vmul.f32 %v784_v37, %v1436_v31  ;;  %s1140_s6 = sshll.u32 %s1223_s5, 4  ;;  %s1141_s6 = int_to_ptr.vmem [resolvable:$false] %s1140_s6 }
  0x6d   : > { %587 = vrot.lane.b32.xlu1 %v584_v22, %s1221_s20  ;;  %585 = vrot.lane.b32.xlu0 %v582_v32, %s1221_s20  ;;  %v1639_v22 = vsel %vm296_vm1, %v754_v20, %v756_v3  ;;  %v765_v32 = vmul.f32 %v763_v27, %v1428_v28  ;;  %v766_v34 = vmul.f32 %v763_v27, %v1422_v23  ;;  %s1142_s7 = scalar_lea.vmem %s1141_s6, 512  ;;  %p1143_p12 = scmp.lt.s32.totalorder %s1711_s29, %s1141_s6 }
  0x6e   : > { %v764_v29 = vmul.f32 %v763_v27, %v1436_v31  ;;  %v794_v50 = vrot.slane %v787_v4, 2  ;;  %p1144_p13 = scmp.lt.s32.totalorder %s1142_s7, %s1136_s4 }
  0x6f   : > { %v771_v38 = vrot.slane %v765_v32, 2  ;;  %v773_v41 = vrot.slane %v766_v34, 2 }
  0x70   : > { %v770_v42 = vrot.slane %v764_v29, 2  ;;  %p1145_p0 = por %p1144_p13, %p1143_p12 }
  0x71   : > { %625 = vrot.lane.b32.xlu1 %v622_v24, %s1222_s24  ;;  %623 = vrot.lane.b32.xlu0 %v620_v51, %s1222_s24  ;;  %v786_v24 = vmul.f32 %v784_v37, %v1428_v28  ;;  %v791_v51 = vrot.slane %v785_v39, 2 }
  0x72   : > { %v772_v49 = vsel %vm296_vm1, %v770_v42, %v771_v38  ;;  %p1146_p1 = pnand %p1145_p0, %p1139_p10 }
  0x75   : > { %646 = vrot.lane.b32.xlu1 %v643_v56, %s1221_s20  ;;  %644 = vrot.lane.b32.xlu0 %v641_v11, %s1221_s20 }
  0x79   : > { %666 = vrot.lane.b32.xlu1 %v661_v48, %s1222_s24  ;;  %664 = vrot.lane.b32.xlu0 %v660_v10, %s1222_s24 }
  0x7d   : > { %680 = vrot.lane.b32.xlu1 %v675_v5, %s1221_s20  ;;  %678 = vrot.lane.b32.xlu0 %v674_v8, %s1221_s20 }
  0x81   : > { %718 = vrot.lane.b32.xlu1 %v1468_v57, %s1222_s24  ;;  %716 = vrot.lane.b32.xlu0 %v1471_v58, %s1222_s24  ;;  %v774_v57 = vsel %vm296_vm1, %v771_v38, %v773_v41  ;;  %v792_v58 = vrot.slane %v786_v24, 2 }
  0x83   : > { %v795_v23 = vsel %vm296_vm1, %v792_v58, %v794_v50  ;;  %v793_v52 = vsel %vm296_vm1, %v791_v51, %v792_v58 }
  0x85   : > { %739 = vrot.lane.b32.xlu1 %v1478_v61, %s1221_s20  ;;  %737 = vrot.lane.b32.xlu0 %v1481_v62, %s1221_s20  ;;  %v195_v61 = vstv %s194_s8 }
  0x86   : > { %v196_v62 = vmul.f32 %v195_v61, %v1323_v1  ;;  %v197_v60 = vmul.f32 %v195_v61, %v1326_v2 }
  0x89   : > { %777 = vrot.lane.b32.xlu1 %v774_v57, %s1222_s24  ;;  %775 = vrot.lane.b32.xlu0 %v772_v49, %s1222_s24  ;;  %s1011_s24 = sld [smem:[#allocation2 + $0x9]] }
  0x8d   : > { %798 = vrot.lane.b32.xlu1 %v795_v23, %s1221_s20  ;;  %796 = vrot.lane.b32.xlu0 %v793_v52, %s1221_s20  ;;  %s1020_s20 = sld [smem:[#allocation2 + $0x12]] }
  0x8f   : > { %v349_v32 = vstv %s1011_s24 }
  0x90   : > { %v351_v29 = vmul.f32 %v349_v32, %v1368_v43  ;;  %v350_v37 = vmul.f32 %v349_v32, %v1374_v47 }
  0xa3   : > { %v221_v53 = vpop.permute.xlu1 %220  ;;  %v207_v54 = vpop.permute.xlu0 %206 }
  0xa4   : > { %v212_v55 = vadd.f32 %v207_v54, %v196_v62 }
  0xa6   : > { %v226_v63 = vadd.f32 %v221_v53, %v212_v55 }
  0xa7   : > { %v223_v30 = vpop.permute.xlu1 %222  ;;  %v209_v56 = vpop.permute.xlu0 %208 }
  0xa8   : > { %v213_v11 = vadd.f32 %v209_v56, %v197_v60  ;;  %v244_v48 = vadd.f32 %v1531_v36, %v226_v63 }
  0xaa   : > { %v227_v10 = vadd.f32 %v223_v30, %v213_v11 }
  0xab   : > { %v262_v12 = vpop.permute.xlu1 %261  ;;  %v260_v14 = vpop.permute.xlu0 %259 }
  0xac   : > { %v245_v15 = vadd.f32 %v1528_v35, %v227_v10  ;;  %v265_v19 = vadd.f32 %v260_v14, %v244_v48  ;;  %v501_v48 = vstv %s1020_s20 }
  0xae   : > { %v266_v18 = vadd.f32 %v262_v12, %v245_v15  ;;  %v502_v12 = vmul.f32 %v501_v48, %v1457_v44 }
  0xaf   : > { %v283_v1 = vpop.permute.xlu1 %282  ;;  %v281_v20 = vpop.permute.xlu0 %280 }
  0xb0   : > { %v287_v3 = vadd.f32 %v283_v1, %v266_v18  ;;  %v286_v21 = vadd.f32 %v281_v20, %v265_v19 }
  0xb2   : > { %v305_v2 = vadd.f32 %v1537_v40, %v287_v3  ;;  %v304_v5 = vadd.f32 %v1543_v46, %v286_v21 }
  0xb3   : > { %v322_v8 = vpop.permute.xlu1 %321  ;;  %v320_v27 = vpop.permute.xlu0 %319 }
  0xb4   : > { %v326_v36 = vadd.f32 %v322_v8, %v305_v2  ;;  %v325_v34 = vadd.f32 %v320_v27, %v304_v5 }
  0xb7   : > { %v343_v35 = vpop.permute.xlu1 %342  ;;  %v341_v38 = vpop.permute.xlu0 %340 }
  0xb8   : > { %v347_v41 = vadd.f32 %v343_v35, %v326_v36  ;;  %v346_v42 = vadd.f32 %v341_v38, %v325_v34 }
  0xba   : > { %v353_v24 = vadd.f32 %v351_v29, %v347_v41  ;;  %v352_v4 = vadd.f32 %v350_v37, %v346_v42 }
  0xbb   : > { %v363_v39 = vpop.permute.xlu1 %362  ;;  %v361_v57 = vpop.permute.xlu0 %360 }
  0xbc   : > { %v367_v40 = vadd.f32 %v363_v39, %v353_v24  ;;  %v366_v49 = vadd.f32 %v361_v57, %v352_v4  ;;  %v653_v57 = vstv %s1029_s9 }
  0xbf   : > { %v377_v46 = vpop.permute.xlu1 %376  ;;  %v375_v58 = vpop.permute.xlu0 %374 }
  0xc0   : > { %v381_v50 = vadd.f32 %v377_v46, %v367_v40  ;;  %v380_v51 = vadd.f32 %v375_v58, %v366_v49  ;;  %v654_v49 = vmul.f32 %v653_v57, %v1436_v31 }
  0xc2   : > { %v398_v23 = vadd.f32 %v1556_v0, %v381_v50  ;;  %v397_v43 = vadd.f32 %v1560_v9, %v380_v51  ;;  %v503_v9 = vmul.f32 %v501_v48, %v1412_v17 }
  0xc3   : > { %v415_v52 = vpop.permute.xlu1 %414  ;;  %v413_v47 = vpop.permute.xlu0 %412 }
  0xc4   : > { %v419_v61 = vadd.f32 %v415_v52, %v398_v23  ;;  %v418_v62 = vadd.f32 %v413_v47, %v397_v43 }
  0xc7   : > { %v436_v53 = vpop.permute.xlu1 %435  ;;  %v434_v54 = vpop.permute.xlu0 %433 }
  0xc8   : > { %v440_v55 = vadd.f32 %v436_v53, %v419_v61  ;;  %v439_v60 = vadd.f32 %v434_v54, %v418_v62 }
  0xca   : > { %v457_v63 = vadd.f32 %v1570_v13, %v440_v55  ;;  %v456_v30 = vadd.f32 %v1575_v16, %v439_v60 }
  0xcb   : > { %v474_v56 = vpop.permute.xlu1 %473  ;;  %v472_v11 = vpop.permute.xlu0 %471 }
  0xcc   : > { %v478_v10 = vadd.f32 %v474_v56, %v457_v63  ;;  %v477_v0 = vadd.f32 %v472_v11, %v456_v30 }
  0xcf   : > { %v495_v14 = vpop.permute.xlu1 %494  ;;  %v493_v15 = vpop.permute.xlu0 %492 }
  0xd0   : > { %v499_v18 = vadd.f32 %v495_v14, %v478_v10  ;;  %v498_v19 = vadd.f32 %v493_v15, %v477_v0 }
  0xd2   : > { %v505_v1 = vadd.f32 %v503_v9, %v499_v18  ;;  %v504_v20 = vadd.f32 %v502_v12, %v498_v19 }
  0xd3   : > { %v515_v3 = vpop.permute.xlu1 %514  ;;  %v513_v21 = vpop.permute.xlu0 %512 }
  0xd4   : > { %v519_v13 = vadd.f32 %v515_v3, %v505_v1  ;;  %v518_v2 = vadd.f32 %v513_v21, %v504_v20 }
  0xd7   : > { %v529_v16 = vpop.permute.xlu1 %528  ;;  %v527_v5 = vpop.permute.xlu0 %526 }
  0xd8   : > { %v533_v8 = vadd.f32 %v529_v16, %v519_v13  ;;  %v532_v27 = vadd.f32 %v527_v5, %v518_v2 }
  0xda   : > { %v550_v32 = vadd.f32 %v1585_v26, %v533_v8  ;;  %v549_v17 = vadd.f32 %v1595_v33, %v532_v27  ;;  %v655_v33 = vmul.f32 %v653_v57, %v1428_v28 }
  0xdb   : > { %v567_v36 = vpop.permute.xlu1 %566  ;;  %v565_v44 = vpop.permute.xlu0 %564 }
  0xdc   : > { %v571_v34 = vadd.f32 %v567_v36, %v550_v32  ;;  %v570_v29 = vadd.f32 %v565_v44, %v549_v17 }
  0xdf   : > { %v588_v37 = vpop.permute.xlu1 %587  ;;  %v586_v35 = vpop.permute.xlu0 %585 }
  0xe0   : > { %v592_v38 = vadd.f32 %v588_v37, %v571_v34  ;;  %v591_v41 = vadd.f32 %v586_v35, %v570_v29 }
  0xe2   : > { %v609_v42 = vadd.f32 %v1601_v45, %v592_v38  ;;  %v608_v24 = vadd.f32 %v1604_v6, %v591_v41 }
  0xe3   : > { %v626_v4 = vpop.permute.xlu1 %625  ;;  %v624_v39 = vpop.permute.xlu0 %623 }
  0xe4   : > { %v630_v40 = vadd.f32 %v626_v4, %v609_v42  ;;  %v629_v26 = vadd.f32 %v624_v39, %v608_v24 }
  0xe7   : > { %v647_v46 = vpop.permute.xlu1 %646  ;;  %v645_v58 = vpop.permute.xlu0 %644 }
  0xe8   : > { %v651_v50 = vadd.f32 %v647_v46, %v630_v40  ;;  %v650_v51 = vadd.f32 %v645_v58, %v629_v26 }
  0xea   : > { %v657_v23 = vadd.f32 %v655_v33, %v651_v50  ;;  %v656_v43 = vadd.f32 %v654_v49, %v650_v51 }
  0xeb   : > { %v667_v52 = vpop.permute.xlu1 %666  ;;  %v665_v47 = vpop.permute.xlu0 %664 }
  0xec   : > { %v671_v45 = vadd.f32 %v667_v52, %v657_v23  ;;  %v670_v61 = vadd.f32 %v665_v47, %v656_v43 }
  0xef   : > { %v681_v6 = vpop.permute.xlu1 %680  ;;  %v679_v62 = vpop.permute.xlu0 %678 }
  0xf0   : > { %v685_v53 = vadd.f32 %v681_v6, %v671_v45  ;;  %v684_v54 = vadd.f32 %v679_v62, %v670_v61 }
  0xf2   : > { %v702_v55 = vadd.f32 %v1619_v7, %v685_v53  ;;  %v701_v28 = vadd.f32 %v1622_v59, %v684_v54  ;;  %v805_v59 = vstv %s1038_s10 }
  0xf3   : > { %v719_v31 = vpop.permute.xlu1 %718  ;;  %v717_v60 = vpop.permute.xlu0 %716 }
  0xf4   : > { %v723_v63 = vadd.f32 %v719_v31, %v702_v55  ;;  %v722_v30 = vadd.f32 %v717_v60, %v701_v28 }
  0xf7   : > { %v740_v56 = vpop.permute.xlu1 %739  ;;  %v738_v11 = vpop.permute.xlu0 %737 }
  0xf8   : > { %v744_v48 = vadd.f32 %v740_v56, %v723_v63  ;;  %v743_v10 = vadd.f32 %v738_v11, %v722_v30 }
  0xfa   : > { %v761_v0 = vadd.f32 %v1639_v22, %v744_v48  ;;  %v760_v9 = vadd.f32 %v1642_v25, %v743_v10 }
  0xfb   : > { %v778_v12 = vpop.permute.xlu1 %777  ;;  %v776_v14 = vpop.permute.xlu0 %775 }
  0xfc   : > { %v782_v7 = vadd.f32 %v778_v12, %v761_v0  ;;  %v781_v15 = vadd.f32 %v776_v14, %v760_v9 }
  0xff   : > { %v799_v18 = vpop.permute.xlu1 %798  ;;  %v797_v19 = vpop.permute.xlu0 %796 }
 0x100   : > { %v803_v1 = vadd.f32 %v799_v18, %v782_v7  ;;  %v802_v20 = vadd.f32 %v797_v19, %v781_v15 }
 0x102   : > { %v807_v3 = vadd.f32 %v805_v59, %v803_v1  ;;  %v806_v21 = vadd.f32 %v805_v59, %v802_v20 }
 0x104   : > { %v826_v13 = vsel %vm808_vm2, %v806_v21, -inf  ;;  %v827_v22 = vsel %vm808_vm2, %v807_v3, -inf  ;;  %v811_v25 = vsel %vm808_vm2, %v806_v21, inf  ;;  %v812_v2 = vsel %vm808_vm2, %v807_v3, inf  ;;  %809 = vst.msk [vmem:[%s174_s17] sm:$0xff] %vm808_vm2, %v806_v21  ;;  %810 = vst.msk [vmem:[%s174_s17 + $0x8] sm:$0xff] %vm808_vm2, %v807_v3 }
 0x105   : > { %v828_v16 = vmax.f32 %v826_v13, %v827_v22  ;;  %v813_v5 = vmin.f32 %v811_v25, %v812_v2  ;;  %v841_v8 = vsel %vm808_vm2, %v806_v21, 0.0  ;;  %v842_v27 = vsel %vm808_vm2, %v807_v3, 0.0 }
 0x106   : > { %v843_v32 = vadd.f32 %v842_v27, %v841_v8  ;;  %v856_v17 = vmul.f32 %v806_v21, %v806_v21  ;;  %v857_v36 = vmul.f32 %v807_v3, %v807_v3 }
 0x107   : > { %829 = vmax.xlane.f32.xlu1 %v828_v16  ;;  %814 = vmin.xlane.f32.xlu0 %v813_v5 }
 0x108   : > { %v858_v44 = vsel %vm808_vm2, %v856_v17, 0.0  ;;  %v859_v34 = vsel %vm808_vm2, %v857_v36, 0.0 }
 0x109   : > { %v860_v29 = vadd.f32 %v859_v34, %v858_v44 }
 0x10b   : > { %844 = vadd.xlane.f32.xlu0 %v843_v32 }
 0x10f   : > { %861 = vadd.xlane.f32.xlu0 %v860_v29 }
 0x110   : > { %1149 = shalt.err (!%p1146_p1)
}
 0x111   : > { %s1150_s8 = scalar_lea.hbm %s1709_s28, 256  ;;  %s1154_s9 = scalar_lea.hbm %s1779_s2, 512 }
 0x112   : > { %p1151_p3 = scmp.ne.s32.totalorder %s1709_s28, %s1150_s8  ;;  %p1155_p8 = scmp.lt.u32.totalorder %s1709_s28, %s1779_s2 }
 0x113   : > { %p1156_p11 = scmp.lt.u32.totalorder %s1154_s9, %s1150_s8  ;;  %p1158_p9 = scmp.lt.u32.totalorder %s1150_s8, %s1709_s28 }
 0x114   : > { %p1152_p4 = pnand %p1151_p3, %p1287_p5 }
 0x115   : > { %p1157_p2 = por %p1156_p11, %p1155_p8 }
 0x116   : > { %p1153_p7 = pneg %p1152_p4 }
 0x117   : > { %p1159_p10 = por %p1158_p9, %p1157_p2 }
 0x119   : > { %p1160_p12 = pnand %p1159_p10, %p1153_p7 }
 0x11b   : > { %1163 = shalt.err (!%p1160_p12)
}
 0x11c   : > { %s1224_s19 = smov 128   ;;  %s1225_s17 = smov 8  }
 0x11d   : > { %1064 = dma.vmem_to_hbm [thread:$0]  (%p1287_p5), %s1711_s29, 256, %s1709_s28, %s1715_s30, %s1224_s19, %s1224_s19, %s1225_s17  }
 0x11e   : > { %s1039_s22 = sshll.u32 %s1268_s16, 7  ;;  %s1164_s8 = scalar_lea.hbm %s1780_s3, 32 }
 0x11f   : > { %s824_s25 = scalar_lea.smem [#allocation7], %s1039_s22  ;;  %p1165_p5 = scmp.ne.s32.totalorder %s1780_s3, %s1164_s8 }
 0x120   : > { %s944_s26 = scalar_lea.smem %s824_s25, 1 [#allocation7]  ;;  %s947_s29 = scalar_lea.smem %s824_s25, 2 [#allocation7] }
 0x121   : > { %s950_s4 = scalar_lea.smem %s824_s25, 3 [#allocation7]  ;;  %p1785_p13 = scmp.eq.s32.totalorder %s1268_s16, 1 }
 0x122   : > { %p1170_p3 = scmp.lt.u32.totalorder %s1164_s8, %s1780_s3 }
 0x123   : > { %p1166_p0 = pnand %p1165_p5, %p1785_p13 }
 0x125   : > { %p1167_p1 = pneg %p1166_p0 }
 0x127   : > { %p1172_p4 = pnand %p1170_p3, %p1167_p1 }
 0x194   : > { %v830_v37 = vpop.xlane.xlu1 %829  ;;  %v815_v35 = vpop.xlane.xlu0 %814 }
 0x195   : > { %v831_v38 = vrot.slane %v830_v37, 4  ;;  %v816_v41 = vrot.slane %v815_v35, 4 }
 0x197   : > { %v832_v42 = vmax.f32 %v830_v37, %v831_v38  ;;  %v817_v24 = vmin.f32 %v815_v35, %v816_v41 }
 0x198   : > { %v845_v4 = vpop.xlane.xlu0 %844 }
 0x199   : > { %v833_v39 = vrot.slane %v832_v42, 2  ;;  %v818_v57 = vrot.slane %v817_v24, 2  ;;  %v846_v40 = vrot.slane %v845_v4, 4 }
 0x19b   : > { %v834_v26 = vmax.f32 %v832_v42, %v833_v39  ;;  %v847_v33 = vadd.f32 %v846_v40, %v845_v4  ;;  %v819_v49 = vmin.f32 %v817_v24, %v818_v57 }
 0x19c   : > { %v862_v46 = vpop.xlane.xlu0 %861 }
 0x19d   : > { %v848_v58 = vrot.slane %v847_v33, 2  ;;  %v863_v50 = vrot.slane %v862_v46, 4  ;;  %v820_v51 = vrot.slane %v819_v49, 1  ;;  %v835_v23 = vrot.slane %v834_v26, 1 }
 0x19f   : > { %v864_v43 = vadd.f32 %v863_v50, %v862_v46  ;;  %v821_v52 = vmin.f32 %v819_v49, %v820_v51  ;;  %v836_v47 = vmax.f32 %v834_v26, %v835_v23  ;;  %v849_v45 = vadd.f32 %v848_v58, %v847_v33 }
 0x1a1   : > { %v865_v61 = vrot.slane %v864_v43, 2  ;;  %1052 = vpush %v821_v52  ;;  %v850_v6 = vrot.slane %v849_v45, 1 }
 0x1a2   : > { %1054 = vpush %v836_v47 }
 0x1a3   : > { %v866_v62 = vadd.f32 %v865_v61, %v864_v43  ;;  %v851_v53 = vadd.f32 %v850_v6, %v849_v45 }
 0x1a5   : > { %1056 = vpush %v851_v53  ;;  %v867_v54 = vrot.slane %v866_v62, 1 }
 0x1a7   : > { %v868_v55 = vadd.f32 %v867_v54, %v866_v62 }
 0x1a9   : > { %1058 = vpush %v868_v55 }
 0x1d2   : > { %s1053_s27 = spop %1052 }
 0x1d3   : > { %825 = sst [smem:[%s824_s25]] %s1053_s27  ;;  %s1055_s28 = spop %1054 }
 0x1d4   : > { %840 = sst [smem:[%s944_s26]] %s1055_s28 }
 0x1d6   : > { %s1057_s30 = spop %1056 }
 0x1d7   : > { %855 = sst [smem:[%s947_s29]] %s1057_s30 }
 0x1da   : > { %s1059_s5 = spop %1058 }
 0x1db   : > { %872 = sst [smem:[%s950_s4]] %s1059_s5 }
 0x1dc   : > { %1175 = shalt.err (!%p1172_p4)
}
 0x1dd   : > { %s1226_s11 = smov [#allocation7]   ;;  %p1786_p7 = pmov %p1785_p13 }
 0x1df   : > { %1066 = dma.smem_to_hbm (%p1786_p7), %s1226_s11, 32, %s1780_s3, [#allocation4]  }
 0x1e0   : > { %p1787_p8 = pmov %p1786_p7 }
 0x1e1   : > { %p1788_p11 = pmov %p1786_p7 }
 0x1e2   : > { %1197 = dma.done.wait (%p1787_p8), [#allocation4], 32  }
 0x1e3   : > { %1199 = vsyncadd (%p1788_p11), [#allocation4], 4294967264 }
 0x1e4   : > { %907 = sfence }
 0x1e5 PF: > { %p1082_p2 = scmp.ge.s32.totalorder %s1218_s15, 2  ;;  %s916_s22 = sand.u32 1, %s1206_s12  }
 0x1e6   : > { %s917_s25 = scalar_lea.sflag [#allocation3], %s916_s22 }
 0x1e7   : > { %p1075_p9 = pnand %p1082_p2, %p1291_p6 }
 0x1e9   : > { %1201 = dma.done.wait (!%p1075_p9), %s917_s25, 256  }
 0x1ea   : > { %1203 = vsyncadd (!%p1075_p9), %s917_s25, 4294967040  ;;  %p16_p10 = scmp.ge.s32.totalorder %s1272_s18, 4   ;;  %s1789_s12 = smov %s1210_s13 }
 0x1eb   : > { %s1790_s13 = smov %s1214_s14  ;;  %s1791_s14 = smov %s1283_s21 }
 0x1ec   : > { %s1792_s15 = smov %s1272_s18  ;;  %18 = sbr.rel (!%p16_p10) target bundleno = 5 (0x5), region = 81 }
 0x1f3   :  { %922 = vsyncpa [#allocation3], 1 }
 0x1f4   :  { %924 = vsyncpa [#allocation3 + $0x1], 1 }
 0x1f5   :  { %925 = vsyncpa [#allocation4], 1 }
 0x1f6   :  { %927 = vsyncpa [#allocation4 + $0x1], 1 }
 0x1f7   :  { %928 = vsyncpa [#allocation5], 1 }
 0x1f8   :  { %930 = vsyncpa [#allocation5 + $0x1], 1 }

</bundles_post_ra>
